<compile_context>
chip_gen: v6e
topology: v6e:2x2x1
jax: 0.10.0
libtpu: 0.0.40
codegen_flags: <defaults>
</compile_context>

<pallas_src>
import functools

import jax
import jax.numpy as jnp
from jax.experimental import pallas as pl
from jax.experimental.pallas import tpu as pltpu


def normalnn_kernel(x_ref, wband_ref, b1_ref, w2_ref, b2_ref, out_ref):
    # x_ref:     (BT, H+2, (W+2)*Cin)        bf16  lane-dense zero-padded input
    # wband_ref: (3, (W+2)*Cin, W*Chid)      bf16  banded conv weight (one per dh)
    # b1_ref:    (1, W*Chid)                 f32   conv bias tiled over W
    # w2_ref:    (W*Chid, ODp)               bf16  classifier weight (incl. 1/(H*W)),
    #                                              tiled over W, out_dim padded to 128
    # b2_ref:    (1, ODp)                    f32
    # out_ref:   (BT, ODp)                   f32   full (padded) logits, lane-dense
    BT, Hp2, WCin = x_ref.shape
    H = Hp2 - 2
    Ncols = wband_ref.shape[2]                      # W * Chid

    x = x_ref[...]                                  # (BT, H+2, (W+2)*Cin) bf16

    # 3x3 SAME conv as 3 banded MXU matmuls (dw shifts folded into the weight).
    def tap(dh):                                    # sublane slice + free leading flatten
        return x[:, dh:dh + H, :].reshape(BT * H, WCin)

    acc = jnp.dot(tap(0), wband_ref[0], preferred_element_type=jnp.float32)
    acc = acc + jnp.dot(tap(1), wband_ref[1], preferred_element_type=jnp.float32)
    acc = acc + jnp.dot(tap(2), wband_ref[2], preferred_element_type=jnp.float32)

    # bias + ReLU epilogue in f32.
    act = jnp.maximum(acc + b1_ref[...], 0.0)       # (BT*H, W*Chid)

    # Pool over H: sublane (XLU) reduce; the 1/(H*W) scale lives in w2.
    row_sum = act.reshape(BT, H, Ncols).sum(axis=1)  # (BT, W*Chid) f32

    # Fused (pool over W) + classifier matmul; unmasked lane-dense store.
    logits = jnp.dot(row_sum.astype(jnp.bfloat16), w2_ref[...],
                     preferred_element_type=jnp.float32) + b2_ref[...]
    out_ref[...] = logits                            # (BT, ODp)


def _choose_batch_tile(B, H, W, Cin, Chid, ODp, vmem_budget):
    """Pick the per-grid-step batch tile BT (and number of steps) from VMEM size."""
    Hp2, Wp2 = H + 2, W + 2
    # Fixed (weight/bias) bytes, assume double-buffered by the pipeline.
    fixed = 2 * (3 * Wp2 * Cin * W * Chid * 2 + W * Chid * ODp * 2
                 + (W * Chid + ODp) * 4)
    # Per-image bytes: double-buffered bf16 input tile + f32 acc/act + out rows.
    per_img = (2 * Hp2 * Wp2 * Cin * 2) + 2 * (H * W * Chid * 4) + 2 * ODp * 4
    headroom = max(vmem_budget - fixed, per_img)
    bt_max = max(1, int(headroom // per_img))
    if bt_max >= B:
        if B >= 16:
            # Keep >=2 balanced steps so a 2-TensorCore chip (v7x) shares the work.
            bt = ((pl.cdiv(B, 2) + 7) // 8) * 8
            return bt, int(pl.cdiv(B, bt))
        return B, 1                                  # single step: block == full dim
    bt = max(8, (bt_max // 8) * 8)                   # multi-step: sublane-aligned tiles
    return bt, int(pl.cdiv(B, bt))


@functools.partial(jax.jit, static_argnames=("class_mask",))
def normalnn_forward(x_nchw, w_conv, b_conv, w_fc, b_fc, class_mask):
    """x_nchw: (B, Cin, H, W) float32. Returns (B, len(class_mask)) float32."""
    B, Cin, H, W = x_nchw.shape
    Chid = w_conv.shape[0]
    out_dim = w_fc.shape[1]
    P = H * W
    Hp2, Wp2 = H + 2, W + 2
    ODp = 128 * pl.cdiv(out_dim, 128)                # lane-pad logits to 128 multiple

    # Generation-aware VMEM budget (falls back to the smallest physical VMEM, v7x).
    try:
        vmem_cap = int(pltpu.get_tpu_info().vmem_capacity_bytes)
    except Exception:
        vmem_cap = 64 * 1024 * 1024
    vmem_limit = min((vmem_cap * 3) // 4, 100 * 1024 * 1024)

    BT, num_steps = _choose_batch_tile(B, H, W, Cin, Chid, ODp, vmem_limit)
    Bp = num_steps * BT

    # Lane-dense bf16 input: NHWC, zero-pad batch + SAME spatial, flatten (W+2, Cin).
    x_nhwc = jnp.transpose(x_nchw, (0, 2, 3, 1)).astype(jnp.float32)
    x_pad = jnp.pad(x_nhwc, ((0, Bp - B), (1, 1), (1, 1), (0, 0)))
    x3 = x_pad.reshape(Bp, Hp2, Wp2 * Cin).astype(jnp.bfloat16)

    # Banded conv weights: W_band[dh][(w+dw)*Cin + c, w*Chid + o] = w_conv[o,c,dh,dw].
    w1 = jnp.transpose(w_conv, (2, 3, 1, 0)).astype(jnp.float32)       # (3,3,Cin,Chid)
    bands = []
    for dh in range(3):
        band = jnp.zeros((Wp2 * Cin, W * Chid), jnp.float32)
        for dw in range(3):
            shift = jnp.eye(Wp2, W, k=-dw, dtype=jnp.float32)          # row w+dw -> col w
            band = band + jnp.kron(shift, w1[dh, dw])
        bands.append(band)
    w_band = jnp.stack(bands, axis=0).astype(jnp.bfloat16)             # (3, Wp2*Cin, W*Chid)

    b1_row = jnp.tile(b_conv.astype(jnp.float32), W).reshape(1, W * Chid)

    # Fused (pool over W) + classifier weight: tile w_fc/(H*W) over the W blocks.
    w2_tiled = jnp.tile(w_fc.astype(jnp.float32) / P, (W, 1))          # (W*Chid, out_dim)
    w2 = (jnp.zeros((W * Chid, ODp), jnp.float32)
          .at[:, :out_dim].set(w2_tiled).astype(jnp.bfloat16))
    b2 = jnp.zeros((1, ODp), jnp.float32).at[:, :out_dim].set(b_fc.astype(jnp.float32))

    logits_full = pl.pallas_call(
        normalnn_kernel,
        out_shape=jax.ShapeDtypeStruct((Bp, ODp), jnp.float32),
        grid=(num_steps,),
        in_specs=[
            pl.BlockSpec((BT, Hp2, Wp2 * Cin), lambda b: (b, 0, 0)),
            pl.BlockSpec((3, Wp2 * Cin, W * Chid), lambda b: (0, 0, 0)),
            pl.BlockSpec((1, W * Chid), lambda b: (0, 0)),
            pl.BlockSpec((W * Chid, ODp), lambda b: (0, 0)),
            pl.BlockSpec((1, ODp), lambda b: (0, 0)),
        ],
        out_specs=pl.BlockSpec((BT, ODp), lambda b: (b, 0)),
        compiler_params=pltpu.CompilerParams(
            dimension_semantics=("parallel",),
            vmem_limit_bytes=vmem_limit,
        ),
    )(x3, w_band, b1_row, w2, b2)

    # class_mask gather done in the wrapper (kernel output stays lane-dense).
    cls = jnp.asarray(class_mask, dtype=jnp.int32)
    return jnp.take(logits_full[:B, :out_dim], cls, axis=1)


def _reference(x_nchw, w_conv, b_conv, w_fc, b_fc, class_mask):
    conv = jax.lax.conv_general_dilated(
        x_nchw, w_conv, window_strides=(1, 1), padding="SAME",
        dimension_numbers=("NCHW", "OIHW", "NCHW"))
    conv = jnp.maximum(conv + b_conv[None, :, None, None], 0.0)
    feat = conv.mean(axis=(2, 3))
    logits = feat @ w_fc + b_fc[None, :]
    return logits[:, jnp.array(class_mask)]


if __name__ == "__main__":
    B, Cin, H, W = 2, 4, 16, 16
    Chid, out_dim = 32, 10
    class_mask = (1, 3, 5, 7, 9)   # NormalNN slices logits with self.class_mask

    key = jax.random.PRNGKey(0)
    k1, k2, k3, k4, k5 = jax.random.split(key, 5)
    x = jax.random.normal(k1, (B, Cin, H, W), dtype=jnp.float32)
    w_conv = 0.1 * jax.random.normal(k2, (Chid, Cin, 3, 3), dtype=jnp.float32)
    b_conv = 0.1 * jax.random.normal(k3, (Chid,), dtype=jnp.float32)
    w_fc = 0.1 * jax.random.normal(k4, (Chid, out_dim), dtype=jnp.float32)
    b_fc = 0.1 * jax.random.normal(k5, (out_dim,), dtype=jnp.float32)

    out = normalnn_forward(x, w_conv, b_conv, w_fc, b_fc, class_mask)
    out = jax.block_until_ready(out)

    ref = _reference(x, w_conv, b_conv, w_fc, b_fc, class_mask)
    assert out.shape == (B, len(class_mask))
    assert jnp.allclose(out, ref, atol=2e-2, rtol=2e-2), "mismatch vs reference"

    print("KERNEL_OK")
</pallas_src>

<mosaic_0001>
module attributes {stable_mosaic.version = 11 : i64} {
  func.func @normalnn_kernel(%arg0: i32, %arg1: memref<2x18x72xbf16, #tpu.memory_space<vmem>>, %arg2: memref<3x72x512xbf16, #tpu.memory_space<vmem>>, %arg3: memref<1x512xf32, #tpu.memory_space<vmem>>, %arg4: memref<512x128xbf16, #tpu.memory_space<vmem>>, %arg5: memref<1x128xf32, #tpu.memory_space<vmem>>, %arg6: memref<2x128xf32, #tpu.memory_space<vmem>>) attributes {dimension_semantics = [#tpu.dimension_semantics<parallel>], iteration_bounds = array<i64: 1>, scalar_prefetch = 0 : i64, scratch_operands = 0 : i64, tpu.core_type = #tpu.core_type<tc>, window_params = [{transform_indices = @transform_0, window_bounds = array<i64: 2, 18, 72>}, {pipeline_mode = #tpu.pipeline_mode<synchronous>, transform_indices = @transform_1, window_bounds = array<i64: 3, 72, 512>}, {pipeline_mode = #tpu.pipeline_mode<synchronous>, transform_indices = @transform_2, window_bounds = array<i64: 1, 512>}, {pipeline_mode = #tpu.pipeline_mode<synchronous>, transform_indices = @transform_3, window_bounds = array<i64: 512, 128>}, {pipeline_mode = #tpu.pipeline_mode<synchronous>, transform_indices = @transform_4, window_bounds = array<i64: 1, 128>}, {transform_indices = @transform_5, window_bounds = array<i64: 2, 128>}]} {
    %c0 = arith.constant 0 : index
    %c0_0 = arith.constant 0 : index
    %c0_1 = arith.constant 0 : index
    %0 = vector.load %arg1[%c0, %c0_0, %c0_1] : memref<2x18x72xbf16, #tpu.memory_space<vmem>>, vector<2x18x72xbf16>
    %1 = vector.extract_strided_slice %0 {offsets = [0, 0, 0], sizes = [2, 16, 72], strides = [1, 1, 1]} : vector<2x18x72xbf16> to vector<2x16x72xbf16>
    %2 = vector.shape_cast %1 : vector<2x16x72xbf16> to vector<32x72xbf16>
    %c0_2 = arith.constant 0 : index
    %c0_3 = arith.constant 0 : index
    %c0_4 = arith.constant 0 : index
    %3 = vector.load %arg2[%c0_2, %c0_3, %c0_4] : memref<3x72x512xbf16, #tpu.memory_space<vmem>>, vector<1x72x512xbf16>
    %4 = vector.shape_cast %3 : vector<1x72x512xbf16> to vector<72x512xbf16>
    %cst = arith.constant dense<0.000000e+00> : vector<32x512xf32>
    %5 = tpu.matmul %2, %4, %cst {dimension_numbers = #tpu.dot_dimension_numbers<[1], [0], [0], [1], [0, 0, 1, 1], [], []>} : vector<32x72xbf16>, vector<72x512xbf16>, vector<32x512xf32> -> vector<32x512xf32>
    %6 = vector.extract_strided_slice %0 {offsets = [0, 1, 0], sizes = [2, 16, 72], strides = [1, 1, 1]} : vector<2x18x72xbf16> to vector<2x16x72xbf16>
    %7 = vector.shape_cast %6 : vector<2x16x72xbf16> to vector<32x72xbf16>
    %c1 = arith.constant 1 : index
    %c0_5 = arith.constant 0 : index
    %c0_6 = arith.constant 0 : index
    %8 = vector.load %arg2[%c1, %c0_5, %c0_6] : memref<3x72x512xbf16, #tpu.memory_space<vmem>>, vector<1x72x512xbf16>
    %9 = vector.shape_cast %8 : vector<1x72x512xbf16> to vector<72x512xbf16>
    %cst_7 = arith.constant dense<0.000000e+00> : vector<32x512xf32>
    %10 = tpu.matmul %7, %9, %cst_7 {dimension_numbers = #tpu.dot_dimension_numbers<[1], [0], [0], [1], [0, 0, 1, 1], [], []>} : vector<32x72xbf16>, vector<72x512xbf16>, vector<32x512xf32> -> vector<32x512xf32>
    %11 = arith.addf %5, %10 : vector<32x512xf32>
    %12 = vector.extract_strided_slice %0 {offsets = [0, 2, 0], sizes = [2, 16, 72], strides = [1, 1, 1]} : vector<2x18x72xbf16> to vector<2x16x72xbf16>
    %13 = vector.shape_cast %12 : vector<2x16x72xbf16> to vector<32x72xbf16>
    %c2 = arith.constant 2 : index
    %c0_8 = arith.constant 0 : index
    %c0_9 = arith.constant 0 : index
    %14 = vector.load %arg2[%c2, %c0_8, %c0_9] : memref<3x72x512xbf16, #tpu.memory_space<vmem>>, vector<1x72x512xbf16>
    %15 = vector.shape_cast %14 : vector<1x72x512xbf16> to vector<72x512xbf16>
    %cst_10 = arith.constant dense<0.000000e+00> : vector<32x512xf32>
    %16 = tpu.matmul %13, %15, %cst_10 {dimension_numbers = #tpu.dot_dimension_numbers<[1], [0], [0], [1], [0, 0, 1, 1], [], []>} : vector<32x72xbf16>, vector<72x512xbf16>, vector<32x512xf32> -> vector<32x512xf32>
    %17 = arith.addf %11, %16 : vector<32x512xf32>
    %c0_11 = arith.constant 0 : index
    %c0_12 = arith.constant 0 : index
    %18 = vector.load %arg3[%c0_11, %c0_12] : memref<1x512xf32, #tpu.memory_space<vmem>>, vector<1x512xf32>
    %19 = vector.broadcast %18 : vector<1x512xf32> to vector<32x512xf32>
    %20 = arith.addf %17, %19 : vector<32x512xf32>
    %cst_13 = arith.constant 0.000000e+00 : f32
    %21 = vector.broadcast %cst_13 : f32 to vector<32x512xf32>
    %22 = arith.maximumf %20, %21 : vector<32x512xf32>
    %23 = vector.shape_cast %22 : vector<32x512xf32> to vector<2x16x512xf32>
    %cst_14 = arith.constant dense<0.000000e+00> : vector<2x512xf32>
    %24 = vector.multi_reduction <add>, %23, %cst_14 [1] : vector<2x16x512xf32> to vector<2x512xf32>
    %25 = arith.truncf %24 : vector<2x512xf32> to vector<2x512xbf16>
    %c0_15 = arith.constant 0 : index
    %c0_16 = arith.constant 0 : index
    %26 = vector.load %arg4[%c0_15, %c0_16] : memref<512x128xbf16, #tpu.memory_space<vmem>>, vector<512x128xbf16>
    %cst_17 = arith.constant dense<0.000000e+00> : vector<2x128xf32>
    %27 = tpu.matmul %25, %26, %cst_17 {dimension_numbers = #tpu.dot_dimension_numbers<[1], [0], [0], [1], [0, 0, 1, 1], [], []>} : vector<2x512xbf16>, vector<512x128xbf16>, vector<2x128xf32> -> vector<2x128xf32>
    %c0_18 = arith.constant 0 : index
    %c0_19 = arith.constant 0 : index
    %28 = vector.load %arg5[%c0_18, %c0_19] : memref<1x128xf32, #tpu.memory_space<vmem>>, vector<1x128xf32>
    %29 = vector.broadcast %28 : vector<1x128xf32> to vector<2x128xf32>
    %30 = arith.addf %27, %29 : vector<2x128xf32>
    %c0_20 = arith.constant 0 : index
    %c0_21 = arith.constant 0 : index
    %31 = vector.load %arg6[%c0_20, %c0_21] : memref<2x128xf32, #tpu.memory_space<vmem>>, vector<2x128xf32>
    tpu.vector_store %arg6[%c0_20, %c0_21], %30 {strides = array<i32>} : memref<2x128xf32, #tpu.memory_space<vmem>>, vector<2x128xf32>,
    return
  }
  func.func @transform_0(%arg0: i32) -> (i32, i32, i32) {
    %c0_i32 = arith.constant 0 : i32
    %c0_i32_0 = arith.constant 0 : i32
    %c0_i32_1 = arith.constant 0 : i32
    return %arg0, %c0_i32, %c0_i32_0 : i32, i32, i32
  }
  func.func @transform_1(%arg0: i32) -> (i32, i32, i32) {
    %c0_i32 = arith.constant 0 : i32
    %c0_i32_0 = arith.constant 0 : i32
    %c0_i32_1 = arith.constant 0 : i32
    %c0_i32_2 = arith.constant 0 : i32
    return %c0_i32, %c0_i32_0, %c0_i32_1 : i32, i32, i32
  }
  func.func @transform_2(%arg0: i32) -> (i32, i32) {
    %c0_i32 = arith.constant 0 : i32
    %c0_i32_0 = arith.constant 0 : i32
    %c0_i32_1 = arith.constant 0 : i32
    return %c0_i32, %c0_i32_0 : i32, i32
  }
  func.func @transform_3(%arg0: i32) -> (i32, i32) {
    %c0_i32 = arith.constant 0 : i32
    %c0_i32_0 = arith.constant 0 : i32
    %c0_i32_1 = arith.constant 0 : i32
    return %c0_i32, %c0_i32_0 : i32, i32
  }
  func.func @transform_4(%arg0: i32) -> (i32, i32) {
    %c0_i32 = arith.constant 0 : i32
    %c0_i32_0 = arith.constant 0 : i32
    %c0_i32_1 = arith.constant 0 : i32
    return %c0_i32, %c0_i32_0 : i32, i32
  }
  func.func @transform_5(%arg0: i32) -> (i32, i32) {
    %c0_i32 = arith.constant 0 : i32
    %c0_i32_0 = arith.constant 0 : i32
    return %arg0, %c0_i32 : i32, i32
  }
}

</mosaic_0001>

<bundles_post_ra>
// kernel: tile.13
= control target key start
LH: loop header
LB: loop body
LE: loop exit
PB: predicated region body
PF: predicated region fallthrough
CT: control target
= control target key end

     0   :  { %s28_s0 = inlined_call_operand.vmem [shape: f32[32], index: 0, kind: input, shape index: {}]   ;;  %s29_s1 = inlined_call_operand.vmem [shape: f32[16,32], index: 1, kind: output, shape index: {}]  }
   0x1   :  { %v4_v0 = vld [vmem:[%s28_s0] ss:$0 sm:$0xff] }
   0x2   :  { %5 = vst [vmem:[%s29_s1] sm:$0xff] %v4_v0  ;;  %8 = vst [vmem:[%s29_s1 + $0x8] sm:$0xff] %v4_v0 }

// kernel: tile.14
= control target key start
LH: loop header
LB: loop body
LE: loop exit
PB: predicated region body
PF: predicated region fallthrough
CT: control target
= control target key end

     0   :  { %s62_s8 = smov 96   ;;  %vm3_vm0 = vcmask 261120   ;;  %s64_s15 = smov 64   ;;  %vm9_vm1 = vcmask 1048320   ;;  %vm15_vm2 = vcmask 785920   ;;  %vm21_vm3 = vcmask 523520   ;;  %s99_s0 = inlined_call_operand.vmem [shape: f32[16,32], index: 0, kind: input, shape index: {}]   ;;  %s100_s1 = inlined_call_operand.vmem [shape: f32[1,512], index: 1, kind: output, shape index: {}]  }
   0x1   :  { %v53_v0 = vld [vmem:[%s99_s0 + $0x3] ss:$4 sm:$0xf]   ;;  %v54_v1 = vld [vmem:[%s99_s0 + $0x2] ss:$4 sm:$0xf]  }
   0x2   :  { %7 = vrot.lane.b32.xlu0 %v53_v0, %s62_s8  ;;  %v55_v2 = vld [vmem:[%s99_s0 + $0x1] ss:$4 sm:$0xf]   ;;  %v2_v3 = vld [vmem:[%s99_s0] ss:$4 sm:$0xf]  }
   0x3   :  { %s63_s0 = smov 32   ;;  %4 = vst.msk [vmem:[#allocation0] ss:$8 sm:$0xf] %vm3_vm0, %v2_v3  }
   0x4   :  { %19 = vrot.lane.b32.xlu1 %v55_v2, %s63_s0 }
   0x6   :  { %13 = vrot.lane.b32.xlu0 %v54_v1, %s64_s15 }
  0x74   :  { %v8_v4 = vpop.permute.xlu0 %7  }
  0x75   :  { %10 = vst.msk [vmem:[#allocation0] ss:$8 sm:$0xf] %vm9_vm1, %v8_v4  }
  0x76   :  { %v20_v5 = vpop.permute.xlu1 %19  }
  0x78   :  { %v14_v6 = vpop.permute.xlu0 %13  }
  0x79   :  { %16 = vst.msk [vmem:[#allocation0] ss:$8 sm:$0xf] %vm15_vm2, %v14_v6  }
  0x7a   :  { %22 = vst.msk [vmem:[#allocation0] ss:$8 sm:$0xf] %vm21_vm3, %v20_v5  }
  0x81   :  { %v27_v7 = vld [vmem:[#allocation0] sm:$0x1]  ;;  %v32_v8 = vld [vmem:[#allocation0 + $0x8] sm:$0x1]  ;;  %v38_v9 = vld [vmem:[#allocation0 + $0x10] sm:$0x1] }
  0x82   :  { %30 = vst [vmem:[%s100_s1] sm:$0x1] %v27_v7  ;;  %56 = vst [vmem:[%s100_s1 + $0x1] sm:$0x1] %v32_v8  ;;  %v45_v10 = vld [vmem:[#allocation0 + $0x18] sm:$0x1] }
  0x83   :  { %57 = vst [vmem:[%s100_s1 + $0x2] sm:$0x1] %v38_v9  ;;  %58 = vst [vmem:[%s100_s1 + $0x3] sm:$0x1] %v45_v10 }

// kernel: normalnn_forward.1
= control target key start
LH: loop header
LB: loop body
LE: loop exit
PB: predicated region body
PF: predicated region fallthrough
CT: control target
= control target key end

     0   :  { %vm218_vm0 = vcmask 1043456   ;;  %v1648_v2 = vmov 0   ;;  %vm45_vm1 = vsmask.f32 3328  ;;  %vm46_vm2 = vsmask.f32 7440  ;;  %s2101_s1 = inlined_call_operand.vmem [shape: bf16[3,72,512], index: 1, kind: input, shape index: {}]   ;;  %s2102_s0 = inlined_call_operand.vmem [shape: bf16[2,18,72], index: 0, kind: input, shape index: {}]   ;;  %s2103_s3 = inlined_call_operand.vmem [shape: bf16[512,128], index: 3, kind: input, shape index: {}]   ;;  %s2104_s2 = inlined_call_operand.vmem [shape: f32[1,512], index: 2, kind: input, shape index: {}]   ;;  %s2105_s4 = inlined_call_operand.vmem [shape: f32[1,128], index: 4, kind: input, shape index: {}]   ;;  %s2106_s5 = inlined_call_operand.vmem [shape: f32[2,128], index: 5, kind: output, shape index: {}]  }
   0x1   :  { %v1346_v0 = vld [vmem:[%s2101_s1 + $0x110] sm:$0xff]  ;;  %v1347_v1 = vld [vmem:[%s2101_s1 + $0x118] sm:$0xff]  ;;  %263 = vmatprep.mubr.bf16.mxu0 %v1648_v2  ;;  %316 = vmatprep.mubr.bf16.mxu1 %v1648_v2  ;;  %v1736_v23 = vld [vmem:[%s2102_s0] sm:$0xf]  ;;  %vm211_vm4 = vcmask 588800   ;;  %vm563_vm5 = vcmask 1042432  }
   0x2   :  { %v1367_v3 = vcombine.high %v1346_v0, %v1346_v0  ;;  %v1369_v4 = vcombine.high %v1347_v1, %v1347_v1  ;;  %v1366_v5 = vcombine.low %v1346_v0, %v1346_v0  ;;  %v1368_v6 = vcombine.low %v1347_v1, %v1347_v1  ;;  %v1534_v7 = vld [vmem:[%s2101_s1 + $0xf4] ss:$16 sps:$4 sm:$0xff]   ;;  %v1536_v8 = vld [vmem:[%s2101_s1 + $0xfc] ss:$16 sps:$4 sm:$0xff]   ;;  %v1538_v11 = vld [vmem:[%s2101_s1 + $0xf0] ss:$16 sps:$4 sm:$0xff]  }
   0x3   :  { %v1539_v12 = vld [vmem:[%s2101_s1 + $0xf8] ss:$16 sps:$4 sm:$0xff]   ;;  %v1540_v13 = vld [vmem:[%s2101_s1 + $0xd4] ss:$16 sps:$4 sm:$0xff]   ;;  %v1542_v14 = vld [vmem:[%s2101_s1 + $0xdc] ss:$16 sps:$4 sm:$0xff]  }
   0x4   :  { %1370 = vmatprep.subr.msk.bf16.mxu0 %vm218_vm0, %v1367_v3  ;;  %1373 = vmatprep.subr.msk.bf16.mxu1 %vm218_vm0, %v1369_v4  ;;  %v220_v9 = vsel %vm218_vm0, %v1366_v5, 0  ;;  %v226_v10 = vsel %vm218_vm0, %v1368_v6, 0  ;;  %v1544_v15 = vld [vmem:[%s2101_s1 + $0xd0] ss:$16 sps:$4 sm:$0xff]   ;;  %v1545_v16 = vld [vmem:[%s2101_s1 + $0xd8] ss:$16 sps:$4 sm:$0xff]   ;;  %vm1772_vm3 = vmor %vm45_vm1, %vm46_vm2 }
   0x5   :  { %238 = vmatpush1.bf16.msra.mxu0 %v220_v9  ;;  %291 = vmatpush1.bf16.msra.mxu1 %v226_v10  ;;  %v1546_v17 = vld [vmem:[%s2101_s1 + $0xb4] ss:$16 sps:$4 sm:$0xff]   ;;  %v1548_v18 = vld [vmem:[%s2101_s1 + $0xbc] ss:$16 sps:$4 sm:$0xff]   ;;  %v1550_v19 = vld [vmem:[%s2101_s1 + $0xb0] ss:$16 sps:$4 sm:$0xff]  }
   0x6   :  { %239 = vmatprep.subr.bf16.mxu0 %v1534_v7  ;;  %292 = vmatprep.subr.bf16.mxu1 %v1536_v8  ;;  %v1551_v20 = vld [vmem:[%s2101_s1 + $0xb8] ss:$16 sps:$4 sm:$0xff]   ;;  %v1552_v21 = vld [vmem:[%s2101_s1 + $0x94] ss:$16 sps:$4 sm:$0xff]   ;;  %v1554_v22 = vld [vmem:[%s2101_s1 + $0x9c] ss:$16 sps:$4 sm:$0xff]  }
   0x7   :  { %v1741_v24 = vld [vmem:[%s2102_s0 + $0x4] sm:$0xf]  ;;  %v1746_v25 = vld [vmem:[%s2102_s0 + $0x8] sm:$0x1]  ;;  %v49_v26 = vshrl.u32 %v1736_v23, 16  ;;  %v52_v27 = vshll.u32 %v1736_v23, 16 }
   0x8   :  { %v58_v28 = vshll.u32 %v1741_v24, 16  ;;  %v62_v29 = vshrl.u32 %v1741_v24, 16  ;;  %v68_v30 = vshll.u32 %v1746_v25, 16  ;;  %v43_v31 = vld [vmem:[%s2101_s1 + $0x80] sm:$0xff]  ;;  %v44_v32 = vld [vmem:[%s2101_s1 + $0x88] sm:$0xff]  ;;  %vm564_vm6 = vcmask 1046532  }
   0x9   :  { %240 = vmatpush1.bf16.msra.mxu0 %v1538_v11  ;;  %293 = vmatpush1.bf16.msra.mxu1 %v1539_v12  ;;  %v51_v33 = vrot.slane %v49_v26, 4  ;;  %v54_v34 = vrot.slane %v52_v27, 5  ;;  %v1556_v37 = vld [vmem:[%s2101_s1 + $0x90] ss:$16 sps:$4 sm:$0xff]   ;;  %v1557_v38 = vld [vmem:[%s2101_s1 + $0x98] ss:$16 sps:$4 sm:$0xff]   ;;  %v1394_v42 = vcombine.low %v43_v31, %v43_v31  ;;  %v1395_v45 = vcombine.high %v43_v31, %v43_v31  ;;  %vm1925_vm7 = vmor %vm563_vm5, %vm564_vm6 }
   0xa   :  { %241 = vmatprep.subr.bf16.mxu0 %v1540_v13  ;;  %294 = vmatprep.subr.bf16.mxu1 %v1542_v14  ;;  %v60_v35 = vrot.slane %v58_v28, 5  ;;  %v64_v36 = vrot.slane %v62_v29, 4  ;;  %v70_v41 = vrot.slane %v68_v30, 5  ;;  %v1768_v43 = vld [vmem:[%s2102_s0 + $0xc] sm:$0xf]  ;;  %v1397_v46 = vcombine.high %v44_v32, %v44_v32  ;;  %v1422_v28 = vld [vmem:[%s2101_s1 + $0x1a0] sm:$0xff] }
   0xb   :  { %v55_v39 = vor.u32 %v54_v34, %v51_v33  ;;  %v1396_v47 = vcombine.low %v44_v32, %v44_v32  ;;  %v1779_v48 = vld [vmem:[%s2102_s0 + $0x10] sm:$0xf]  ;;  %v1784_v49 = vld [vmem:[%s2102_s0 + $0x14] sm:$0x1]  ;;  %v73_v50 = vshrl.u32 %v1768_v43, 16  ;;  %v76_v53 = vshll.u32 %v1768_v43, 16 }
   0xc   :  { %v65_v40 = vor.u32 %v64_v36, %v60_v35  ;;  %v82_v55 = vshll.u32 %v1779_v48, 16  ;;  %v86_v56 = vshrl.u32 %v1779_v48, 16  ;;  %v92_v57 = vshll.u32 %v1784_v49, 16  ;;  %v1564_v61 = vld [vmem:[%s2101_s1 + $0x64] ss:$16 sps:$4 sm:$0xff]   ;;  %v1423_v29 = vld [vmem:[%s2101_s1 + $0x1a8] sm:$0xff] }
   0xd   :  { %242 = vmatpush1.bf16.msra.mxu0 %v1544_v15  ;;  %295 = vmatpush1.bf16.msra.mxu1 %v1545_v16  ;;  %v56_v51 = vrot.slane %v55_v39, 4  ;;  %v75_v54 = vrot.slane %v73_v50, 4  ;;  %v444_v60 = vsel %vm218_vm0, %v1394_v42, 0  ;;  %v78_v62 = vrot.slane %v76_v53, 5  ;;  %v1567_v1 = vld [vmem:[%s2101_s1 + $0x6c] ss:$16 sps:$4 sm:$0xff]  }
   0xe   :  { %243 = vmatprep.subr.bf16.mxu0 %v1546_v17  ;;  %296 = vmatprep.subr.bf16.mxu1 %v1548_v18  ;;  %v66_v52 = vrot.slane %v65_v40, 4  ;;  %v450_v0 = vsel %vm218_vm0, %v1396_v47, 0  ;;  %v84_v3 = vrot.slane %v82_v55, 5  ;;  %v88_v4 = vrot.slane %v86_v56, 4  ;;  %v1562_v8 = vld [vmem:[%s2101_s1 + $0x60] ss:$16 sps:$4 sm:$0xff]  }
   0xf   :  { %v61_v58 = vsel %vm1772_vm3, %v56_v51, %v60_v35  ;;  %v79_v5 = vor.u32 %v78_v62, %v75_v54  ;;  %v94_v7 = vrot.slane %v92_v57, 5  ;;  %v1565_v9 = vld [vmem:[%s2101_s1 + $0x68] ss:$16 sps:$4 sm:$0xff]   ;;  %v1570_v12 = vld [vmem:[%s2101_s1 + $0x44] ss:$16 sps:$4 sm:$0xff]   ;;  %v1443_v32 = vcombine.high %v1422_v28, %v1422_v28 }
  0x10   :  { %v71_v59 = vsel %vm1772_vm3, %v66_v52, %v70_v41  ;;  %v89_v6 = vor.u32 %v88_v4, %v84_v3  ;;  %v1573_v13 = vld [vmem:[%s2101_s1 + $0x4c] ss:$16 sps:$4 sm:$0xff]   ;;  %v1568_v16 = vld [vmem:[%s2101_s1 + $0x40] ss:$16 sps:$4 sm:$0xff]   ;;  %v1571_v17 = vld [vmem:[%s2101_s1 + $0x48] ss:$16 sps:$4 sm:$0xff]   ;;  %v1445_v33 = vcombine.high %v1423_v29, %v1423_v29  ;;  %v1442_v34 = vcombine.low %v1422_v28, %v1422_v28 }
  0x11   :  { %244 = vmatpush1.bf16.msra.mxu0 %v1550_v19  ;;  %297 = vmatpush1.bf16.msra.mxu1 %v1551_v20  ;;  %v1348_v63 = vcombine.low %v61_v58, %v71_v59  ;;  %v80_v10 = vrot.slane %v79_v5, 4  ;;  %v1576_v19 = vld [vmem:[%s2101_s1 + $0x24] ss:$16 sps:$4 sm:$0xff]   ;;  %v1579_v20 = vld [vmem:[%s2101_s1 + $0x2c] ss:$16 sps:$4 sm:$0xff]   ;;  %v1444_v35 = vcombine.low %v1423_v29, %v1423_v29  ;;  %v1376_v36 = vcombine.low %v1736_v23, %v1741_v24 }
  0x12   :  { %245 = vmatprep.subr.bf16.mxu0 %v1552_v21  ;;  %298 = vmatprep.subr.bf16.mxu1 %v1554_v22  ;;  %v90_v11 = vrot.slane %v89_v6, 4  ;;  %v1574_v21 = vld [vmem:[%s2101_s1 + $0x20] ss:$16 sps:$4 sm:$0xff]   ;;  %v1577_v22 = vld [vmem:[%s2101_s1 + $0x28] ss:$16 sps:$4 sm:$0xff]   ;;  %v568_v47 = vrot.slane %v1741_v24, 5 }
  0x13   :  { %v85_v14 = vsel %vm1772_vm3, %v80_v10, %v84_v3  ;;  %v1582_v26 = vld [vmem:[%s2101_s1 + $0x4] ss:$16 sps:$4 sm:$0xff]   ;;  %v1585_v27 = vld [vmem:[%s2101_s1 + $0xc] ss:$16 sps:$4 sm:$0xff]   ;;  %v1580_v30 = vld [vmem:[%s2101_s1] ss:$16 sps:$4 sm:$0xff]  }
  0x14   :  { %v95_v15 = vsel %vm1772_vm3, %v90_v11, %v94_v7  ;;  %v1583_v31 = vld [vmem:[%s2101_s1 + $0x8] ss:$16 sps:$4 sm:$0xff]   ;;  %v1593_v39 = vld [vmem:[%s2101_s1 + $0x184] ss:$16 sps:$4 sm:$0xff]   ;;  %v1596_v40 = vld [vmem:[%s2101_s1 + $0x18c] ss:$16 sps:$4 sm:$0xff]  }
  0x15   :  { %246 = vmatpush1.bf16.msra.mxu0 %v1556_v37  ;;  %299 = vmatpush1.bf16.msra.mxu1 %v1557_v38  ;;  %v1349_v18 = vcombine.low %v85_v14, %v95_v15  ;;  %v702_v37 = vsel %vm218_vm0, %v1442_v34, 0  ;;  %v708_v38 = vsel %vm218_vm0, %v1444_v35, 0  ;;  %v1591_v41 = vld [vmem:[%s2101_s1 + $0x180] ss:$16 sps:$4 sm:$0xff]   ;;  %v1594_v42 = vld [vmem:[%s2101_s1 + $0x188] ss:$16 sps:$4 sm:$0xff]  }
  0x16   :  { %1398 = vmatprep.subr.msk.bf16.mxu0 %vm218_vm0, %v1395_v45  ;;  %1401 = vmatprep.subr.msk.bf16.mxu1 %vm218_vm0, %v1397_v46  ;;  %v1600_v44 = vld [vmem:[%s2101_s1 + $0x164] ss:$16 sps:$4 sm:$0xff]   ;;  %v1603_v45 = vld [vmem:[%s2101_s1 + $0x16c] ss:$16 sps:$4 sm:$0xff]   ;;  %v1377_v46 = vcombine.low %v1768_v43, %v1779_v48  ;;  %v1598_v50 = vld [vmem:[%s2101_s1 + $0x160] ss:$16 sps:$4 sm:$0xff]  }
  0x17   :  { %v1601_v51 = vld [vmem:[%s2101_s1 + $0x168] ss:$16 sps:$4 sm:$0xff]   ;;  %v1606_v52 = vld [vmem:[%s2101_s1 + $0x144] ss:$16 sps:$4 sm:$0xff]   ;;  %v1609_v24 = vld [vmem:[%s2101_s1 + $0x14c] ss:$16 sps:$4 sm:$0xff]  }
  0x18   :  { %1371 = vmatmul.mubr.msk.bf16.vlgmr.msra.gmra.mxu0 %vm211_vm4, %v1348_v63  ;;  %1374 = vmatmul.mubr.msk.bf16.vlgmr.msra.gmra.mxu1 %vm211_vm4, %v1348_v63  ;;  %v571_v53 = vrot.slane %v1746_v25, 5  ;;  %v1604_v54 = vld [vmem:[%s2101_s1 + $0x140] ss:$16 sps:$4 sm:$0xff]   ;;  %v1607_v55 = vld [vmem:[%s2101_s1 + $0x148] ss:$16 sps:$4 sm:$0xff]   ;;  %v1404_v56 = vrot.slane %v1736_v23, 9 }
  0x19   :  { %462 = vmatpush1.bf16.msra.mxu0 %v444_v60  ;;  %515 = vmatpush1.bf16.msra.mxu1 %v450_v0  ;;  %v570_v57 = vrot.slane %v568_v47, 4  ;;  %v1612_v25 = vld [vmem:[%s2101_s1 + $0x124] ss:$16 sps:$4 sm:$0xff]   ;;  %v1615_v58 = vld [vmem:[%s2101_s1 + $0x12c] ss:$16 sps:$4 sm:$0xff]   ;;  %v575_v63 = vrot.slane %v1779_v48, 5 }
  0x1a   :  { %463 = vmatprep.subr.bf16.mxu0 %v1564_v61  ;;  %516 = vmatprep.subr.bf16.mxu1 %v1567_v1  ;;  %v1610_v23 = vld [vmem:[%s2101_s1 + $0x120] ss:$16 sps:$4 sm:$0xff]   ;;  %v1613_v60 = vld [vmem:[%s2101_s1 + $0x128] ss:$16 sps:$4 sm:$0xff]   ;;  %v569_v61 = vsel %vm1925_vm7, %v1404_v56, %v568_v47  ;;  %v1405_v1 = vrot.slane %v1768_v43, 9  ;;  %v578_v4 = vrot.slane %v1784_v49, 5 }
  0x1b   :  { %273 = vmatprep.mubr.bf16.mxu0 %v1648_v2  ;;  %326 = vmatprep.mubr.bf16.mxu1 %v1648_v2  ;;  %v572_v62 = vsel %vm1925_vm7, %v570_v57, %v571_v53  ;;  %v577_v3 = vrot.slane %v575_v63, 4  ;;  %v1616_v43 = vld [vmem:[%s2103_s3 + $0x78] sm:$0xff]   ;;  %v1622_v10 = vld [vmem:[%s2103_s3 + $0x30] sm:$0xff]   ;;  %v1626_v14 = vld [vmem:[%s2103_s3 + $0x28] sm:$0xff]   ;;  %vm1040_vm8 = vcmask 1041409  }
  0x1c   :  { %v1424_v0 = vcombine.low %v569_v61, %v572_v62  ;;  %v576_v48 = vsel %vm1925_vm7, %v1405_v1, %v575_v63  ;;  %v1617_v49 = vld [vmem:[%s2103_s3 + $0xf8] sm:$0xff]   ;;  %v1623_v11 = vld [vmem:[%s2103_s3 + $0xb0] sm:$0xff]   ;;  %v1627_v15 = vld [vmem:[%s2103_s3 + $0xa8] sm:$0xff]  }
  0x1d   :  { %464 = vmatpush1.bf16.msra.mxu0 %v1562_v8  ;;  %517 = vmatpush1.bf16.msra.mxu1 %v1565_v9  ;;  %v579_v5 = vsel %vm1925_vm7, %v577_v3, %v578_v4  ;;  %v1619_v7 = vld [vmem:[%s2103_s3 + $0xb8] sm:$0xff]   ;;  %v1620_v8 = vld [vmem:[%s2103_s3 + $0x70] sm:$0xff]   ;;  %v1643_v34 = vld [vmem:[%s2103_s3 + $0x88] sm:$0xff]   ;;  %v837_v4 = vlaneseq }
  0x1e   :  { %465 = vmatprep.subr.bf16.mxu0 %v1570_v12  ;;  %518 = vmatprep.subr.bf16.mxu1 %v1573_v13  ;;  %v1425_v6 = vcombine.low %v576_v48, %v579_v5  ;;  %v1621_v9 = vld [vmem:[%s2103_s3 + $0xf0] sm:$0xff]   ;;  %v1624_v12 = vld [vmem:[%s2103_s3 + $0x68] sm:$0xff]   ;;  %v1644_v35 = vld [vmem:[%s2103_s3 + $0x40] sm:$0xff]  }
  0x1f   :  { %v1625_v13 = vld [vmem:[%s2103_s3 + $0xe8] sm:$0xff]   ;;  %v1637_v28 = vld [vmem:[%s2103_s3 + $0xd0] sm:$0xff]  }
  0x20   :  { %1372 = vmatmul.mubr.msk.bf16.gmra.mxu0 %vm211_vm4, %v1349_v18  ;;  %1375 = vmatmul.mubr.msk.bf16.gmra.mxu1 %vm211_vm4, %v1349_v18  ;;  %v1630_v18 = vld [vmem:[%s2103_s3 + $0x20] sm:$0xff]   ;;  %v1638_v29 = vld [vmem:[%s2103_s3 + $0x10] sm:$0xff]  }
  0x21   :  { %466 = vmatpush1.bf16.msra.mxu0 %v1568_v16  ;;  %519 = vmatpush1.bf16.msra.mxu1 %v1571_v17  ;;  %v1628_v16 = vld [vmem:[%s2103_s3 + $0x60] sm:$0xff]  }
  0x22   :  { %467 = vmatprep.subr.bf16.mxu0 %v1576_v19  ;;  %520 = vmatprep.subr.bf16.mxu1 %v1579_v20  ;;  %v1629_v17 = vld [vmem:[%s2103_s3 + $0xe0] sm:$0xff]   ;;  %v1632_v20 = vld [vmem:[%s2103_s3 + $0x58] sm:$0xff]  }
  0x23   :  { %487 = vmatprep.mubr.bf16.mxu0 %v1648_v2  ;;  %540 = vmatprep.mubr.bf16.mxu1 %v1648_v2  ;;  %v1631_v19 = vld [vmem:[%s2103_s3 + $0xa0] sm:$0xff]  }
  0x25   :  { %468 = vmatpush1.bf16.msra.mxu0 %v1574_v21  ;;  %521 = vmatpush1.bf16.msra.mxu1 %v1577_v22  ;;  %v1633_v21 = vld [vmem:[%s2103_s3 + $0xd8] sm:$0xff]  }
  0x26   :  { %469 = vmatprep.subr.bf16.mxu0 %v1582_v26  ;;  %522 = vmatprep.subr.bf16.mxu1 %v1585_v27  ;;  %v1634_v22 = vld [vmem:[%s2103_s3 + $0x18] sm:$0xff]   ;;  %v1636_v27 = vld [vmem:[%s2103_s3 + $0x50] sm:$0xff]  }
  0x27   :  { %v1635_v26 = vld [vmem:[%s2103_s3 + $0x98] sm:$0xff]  }
  0x29   :  { %470 = vmatpush1.bf16.msra.mxu0 %v1580_v30  ;;  %523 = vmatpush1.bf16.msra.mxu1 %v1583_v31  ;;  %v1639_v30 = vld [vmem:[%s2103_s3 + $0x90] sm:$0xff]   ;;  %v1640_v31 = vld [vmem:[%s2103_s3 + $0x48] sm:$0xff]  }
  0x2a   :  { %1446 = vmatprep.subr.msk.bf16.mxu0 %vm218_vm0, %v1443_v32  ;;  %1449 = vmatprep.subr.msk.bf16.mxu1 %vm218_vm0, %v1445_v33  ;;  %v1641_v32 = vld [vmem:[%s2103_s3 + $0xc8] sm:$0xff]  }
  0x2b   :  { %v1642_v33 = vld [vmem:[%s2103_s3 + $0x8] sm:$0xff]  }
  0x2c   :  { %1399 = vmatmul.mubr.msk.bf16.vlgmr.msra.gmra.mxu0 %vm211_vm4, %v1376_v36  ;;  %1402 = vmatmul.mubr.msk.bf16.vlgmr.msra.gmra.mxu1 %vm211_vm4, %v1376_v36  ;;  %v1645_v36 = vld [vmem:[%s2103_s3 + $0xc0] sm:$0xff]  }
  0x2d   :  { %720 = vmatpush1.bf16.msra.mxu0 %v702_v37  ;;  %773 = vmatpush1.bf16.msra.mxu1 %v708_v38  ;;  %v1646_v37 = vld [vmem:[%s2103_s3] sm:$0xff]  }
  0x2e   :  { %721 = vmatprep.subr.bf16.mxu0 %v1593_v39  ;;  %774 = vmatprep.subr.bf16.mxu1 %v1596_v40  ;;  %v1647_v38 = vld [vmem:[%s2103_s3 + $0x80] sm:$0xff]  }
  0x2f   :  { %497 = vmatprep.mubr.bf16.mxu0 %v1648_v2  ;;  %550 = vmatprep.mubr.bf16.mxu1 %v1648_v2 }
  0x31   :  { %722 = vmatpush1.bf16.msra.mxu0 %v1591_v41  ;;  %775 = vmatpush1.bf16.msra.mxu1 %v1594_v42 }
  0x32   :  { %723 = vmatprep.subr.bf16.mxu0 %v1600_v44  ;;  %776 = vmatprep.subr.bf16.mxu1 %v1603_v45 }
  0x34   :  { %1400 = vmatmul.mubr.msk.bf16.gmra.mxu0 %vm211_vm4, %v1377_v46  ;;  %1403 = vmatmul.mubr.msk.bf16.gmra.mxu1 %vm211_vm4, %v1377_v46 }
  0x35   :  { %724 = vmatpush1.bf16.msra.mxu0 %v1598_v50  ;;  %777 = vmatpush1.bf16.msra.mxu1 %v1601_v51 }
  0x36   :  { %725 = vmatprep.subr.bf16.mxu0 %v1606_v52  ;;  %778 = vmatprep.subr.bf16.mxu1 %v1609_v24 }
  0x37   :  { %745 = vmatprep.mubr.bf16.mxu0 %v1648_v2  ;;  %798 = vmatprep.mubr.bf16.mxu1 %v1648_v2 }
  0x39   :  { %726 = vmatpush1.bf16.msra.mxu0 %v1604_v54  ;;  %779 = vmatpush1.bf16.msra.mxu1 %v1607_v55 }
  0x3a   :  { %727 = vmatprep.subr.bf16.mxu0 %v1612_v25  ;;  %780 = vmatprep.subr.bf16.mxu1 %v1615_v58 }
  0x3d   :  { %728 = vmatpush1.bf16.msra.mxu0 %v1610_v23  ;;  %781 = vmatpush1.bf16.msra.mxu1 %v1613_v60 }
  0x3e   :  { %1485 = vmatprep.subr.bf16.mxu0 %v1616_v43  ;;  %1507 = vmatprep.subr.bf16.mxu1 %v1617_v49 }
  0x40   :  { %1447 = vmatmul.mubr.msk.bf16.vlgmr.msra.gmra.mxu0 %vm211_vm4, %v1424_v0  ;;  %1450 = vmatmul.mubr.msk.bf16.vlgmr.msra.gmra.mxu1 %vm211_vm4, %v1424_v0 }
  0x41   :  { %755 = vmatprep.mubr.bf16.mxu0 %v1648_v2  ;;  %808 = vmatprep.mubr.bf16.mxu1 %v1648_v2  ;;  %v1618_v2 = vld [vmem:[%s2103_s3 + $0x38] sm:$0xff]  }
  0x42   :  { %1486 = vmatpush3.bf16.msra.mxu0 %v1618_v2  ;;  %1508 = vmatpush3.bf16.msra.mxu1 %v1619_v7 }
  0x43   :  { %1487 = vmatprep.subr.bf16.mxu0 %v1620_v8  ;;  %1509 = vmatprep.subr.bf16.mxu1 %v1621_v9  ;;  %v835_v8 = vld [vmem:[%s2104_s2] sm:$0xf] }
  0x46   :  { %1488 = vmatpush3.bf16.msra.mxu0 %v1622_v10  ;;  %1510 = vmatpush3.bf16.msra.mxu1 %v1623_v11 }
  0x47   :  { %1489 = vmatprep.subr.bf16.mxu0 %v1624_v12  ;;  %1511 = vmatprep.subr.bf16.mxu1 %v1625_v13 }
  0x48   :  { %1448 = vmatmul.mubr.msk.bf16.gmra.mxu0 %vm211_vm4, %v1425_v6  ;;  %1451 = vmatmul.mubr.msk.bf16.gmra.mxu1 %vm211_vm4, %v1425_v6  ;;  %v838_v6 = vshrl.u32 %v837_v4, 7 }
  0x4a   :  { %1490 = vmatpush3.bf16.msra.mxu0 %v1626_v14  ;;  %1512 = vmatpush3.bf16.msra.mxu1 %v1627_v15  ;;  %v839_v2 = vsub.s32 0, %v838_v6  ;;  %v847_v7 = vsub.s32 2, %v838_v6  ;;  %v843_v9 = vsub.s32 1, %v838_v6  ;;  %v851_v10 = vsub.s32 3, %v838_v6 }
  0x4b   :  { %1491 = vmatprep.subr.bf16.mxu0 %v1628_v16  ;;  %1513 = vmatprep.subr.bf16.mxu1 %v1629_v17 }
  0x4e   :  { %1492 = vmatpush3.bf16.msra.mxu0 %v1630_v18  ;;  %1514 = vmatpush3.bf16.msra.mxu1 %v1631_v19  ;;  %v2065_v18 = vrot.slane %v835_v8, %v839_v2 }
  0x4f   :  { %1493 = vmatprep.subr.bf16.mxu0 %v1632_v20  ;;  %1515 = vmatprep.subr.bf16.mxu1 %v1633_v21  ;;  %v2067_v20 = vrot.slane %v835_v8, %v847_v7 }
  0x52   :  { %1494 = vmatpush3.bf16.msra.mxu0 %v1634_v22  ;;  %1516 = vmatpush3.bf16.msra.mxu1 %v1635_v26 }
  0x53   :  { %1495 = vmatprep.subr.bf16.mxu0 %v1636_v27  ;;  %1517 = vmatprep.subr.bf16.mxu1 %v1637_v28  ;;  %v2069_v27 = vrot.slane %v835_v8, %v843_v9 }
  0x56   :  { %1496 = vmatpush3.bf16.msra.mxu0 %v1638_v29  ;;  %1518 = vmatpush3.bf16.msra.mxu1 %v1639_v30  ;;  %v2071_v29 = vrot.slane %v835_v8, %v851_v10 }
  0x57   :  { %1497 = vmatprep.subr.bf16.mxu0 %v1640_v31  ;;  %1519 = vmatprep.subr.bf16.mxu1 %v1641_v32 }
  0x5a   :  { %1498 = vmatpush3.bf16.msra.mxu0 %v1642_v33  ;;  %1520 = vmatpush3.bf16.msra.mxu1 %v1643_v34 }
  0x5b   :  { %1499 = vmatprep.subr.bf16.mxu0 %v1644_v35  ;;  %1521 = vmatprep.subr.bf16.mxu1 %v1645_v36 }
  0x5e   :  { %1500 = vmatpush3.bf16.msra.mxu0 %v1646_v37  ;;  %1522 = vmatpush3.bf16.msra.mxu1 %v1647_v38 }
  0xd8   :  { %v265_v39 = vpop.f32.mrf.mxu0  ;;  %v318_v40 = vpop.f32.mrf.mxu1 }
  0xda   :  { %v267_v41 = vpop.f32.mrf.mxu0  ;;  %v320_v42 = vpop.f32.mrf.mxu1 }
  0xdc   :  { %v269_v44 = vpop.f32.mrf.mxu0  ;;  %v322_v45 = vpop.f32.mrf.mxu1 }
  0xde   :  { %v271_v46 = vpop.f32.mrf.mxu0  ;;  %v324_v47 = vpop.f32.mrf.mxu1 }
  0xe0   :  { %v275_v50 = vpop.f32.mrf.mxu0  ;;  %v328_v51 = vpop.f32.mrf.mxu1 }
  0xe2   :  { %v277_v52 = vpop.f32.mrf.mxu0  ;;  %v330_v24 = vpop.f32.mrf.mxu1 }
  0xe4   :  { %v2050_v53 = vpop.f32.mrf.mxu0  ;;  %v2052_v54 = vpop.f32.mrf.mxu1 }
  0xe6   :  { %v2054_v55 = vpop.f32.mrf.mxu0  ;;  %v2056_v56 = vpop.f32.mrf.mxu1 }
  0xec   :  { %v489_v57 = vpop.f32.mrf.mxu0  ;;  %v542_v25 = vpop.f32.mrf.mxu1 }
  0xed   :  { %v490_v11 = vadd.f32 %v489_v57, %v265_v39  ;;  %v543_v12 = vadd.f32 %v542_v25, %v318_v40 }
  0xee   :  { %v491_v58 = vpop.f32.mrf.mxu0  ;;  %v544_v59 = vpop.f32.mrf.mxu1 }
  0xef   :  { %v492_v15 = vadd.f32 %v491_v58, %v267_v41  ;;  %v545_v16 = vadd.f32 %v544_v59, %v320_v42 }
  0xf0   :  { %v493_v23 = vpop.f32.mrf.mxu0  ;;  %v546_v60 = vpop.f32.mrf.mxu1 }
  0xf1   :  { %v494_v30 = vadd.f32 %v493_v23, %v269_v44  ;;  %v547_v31 = vadd.f32 %v546_v60, %v322_v45 }
  0xf2   :  { %v495_v61 = vpop.f32.mrf.mxu0  ;;  %v548_v62 = vpop.f32.mrf.mxu1 }
  0xf3   :  { %v496_v32 = vadd.f32 %v495_v61, %v271_v46  ;;  %v549_v33 = vadd.f32 %v548_v62, %v324_v47 }
  0xf4   :  { %v499_v63 = vpop.f32.mrf.mxu0  ;;  %v552_v0 = vpop.f32.mrf.mxu1 }
  0xf5   :  { %v500_v36 = vadd.f32 %v499_v63, %v275_v50  ;;  %v553_v37 = vadd.f32 %v552_v0, %v328_v51 }
  0xf6   :  { %v501_v1 = vpop.f32.mrf.mxu0  ;;  %v554_v3 = vpop.f32.mrf.mxu1 }
  0xf7   :  { %v502_v38 = vadd.f32 %v501_v1, %v277_v52  ;;  %v555_v39 = vadd.f32 %v554_v3, %v330_v24 }
  0xf8   :  { %v503_v48 = vpop.f32.mrf.mxu0  ;;  %v556_v5 = vpop.f32.mrf.mxu1 }
  0xf9   :  { %v504_v47 = vadd.f32 %v503_v48, %v2050_v53  ;;  %v557_v50 = vadd.f32 %v556_v5, %v2052_v54 }
  0xfa   :  { %v2058_v43 = vpop.f32.mrf.mxu0  ;;  %v2060_v49 = vpop.f32.mrf.mxu1 }
 0x100   :  { %v747_v13 = vpop.f32.mrf.mxu0  ;;  %v800_v14 = vpop.f32.mrf.mxu1 }
 0x101   :  { %v819_v17 = vadd.f32 %v747_v13, %v490_v11  ;;  %v821_v19 = vadd.f32 %v800_v14, %v543_v12  ;;  %v506_v13 = vadd.f32 %v2058_v43, %v2054_v55  ;;  %v559_v14 = vadd.f32 %v2060_v49, %v2056_v56 }
 0x102   :  { %v749_v21 = vpop.f32.mrf.mxu0  ;;  %v802_v22 = vpop.f32.mrf.mxu1 }
 0x103   :  { %v820_v26 = vadd.f32 %v749_v21, %v492_v15  ;;  %v822_v28 = vadd.f32 %v802_v22, %v545_v16  ;;  %v857_v40 = vadd.f32 %v2065_v18, %v819_v17  ;;  %v859_v41 = vadd.f32 %v2067_v20, %v821_v19 }
 0x104   :  { %v751_v34 = vpop.f32.mrf.mxu0  ;;  %v804_v35 = vpop.f32.mrf.mxu1 }
 0x105   :  { %v823_v42 = vadd.f32 %v751_v34, %v494_v30  ;;  %v825_v57 = vadd.f32 %v804_v35, %v547_v31  ;;  %v858_v59 = vadd.f32 %v2069_v27, %v820_v26  ;;  %v860_v44 = vadd.f32 %v2071_v29, %v822_v28 }
 0x106   :  { %v753_v25 = vpop.f32.mrf.mxu0  ;;  %v806_v58 = vpop.f32.mrf.mxu1  ;;  %v873_v0 = vmax.f32 %v857_v40, 0.0  ;;  %v875_v1 = vmax.f32 %v859_v41, 0.0 }
 0x107   :  { %v824_v45 = vadd.f32 %v753_v25, %v496_v32  ;;  %v826_v46 = vadd.f32 %v806_v58, %v549_v33  ;;  %v861_v51 = vadd.f32 %v2065_v18, %v823_v42  ;;  %v863_v52 = vadd.f32 %v2067_v20, %v825_v57 }
 0x108   :  { %v757_v24 = vpop.f32.mrf.mxu0  ;;  %v810_v23 = vpop.f32.mrf.mxu1  ;;  %v874_v48 = vmax.f32 %v858_v59, 0.0  ;;  %v876_v54 = vmax.f32 %v860_v44, 0.0 }
 0x109   :  { %v862_v60 = vadd.f32 %v2069_v27, %v824_v45  ;;  %v864_v61 = vadd.f32 %v2071_v29, %v826_v46  ;;  %v827_v62 = vadd.f32 %v757_v24, %v500_v36  ;;  %v829_v63 = vadd.f32 %v810_v23, %v553_v37 }
 0x10a   :  { %v877_v3 = vmax.f32 %v861_v51, 0.0  ;;  %v879_v4 = vmax.f32 %v863_v52, 0.0  ;;  %v759_v6 = vpop.f32.mrf.mxu0  ;;  %v812_v53 = vpop.f32.mrf.mxu1 }
 0x10b   :  { %v878_v5 = vmax.f32 %v862_v60, 0.0  ;;  %v880_v2 = vmax.f32 %v864_v61, 0.0  ;;  %v865_v9 = vadd.f32 %v2065_v18, %v827_v62  ;;  %v867_v10 = vadd.f32 %v2067_v20, %v829_v63 }
 0x10c   :  { %v889_v7 = vadd.f32 %v877_v3, %v873_v0  ;;  %v903_v8 = vadd.f32 %v879_v4, %v875_v1  ;;  %v761_v11 = vpop.f32.mrf.mxu0  ;;  %v814_v12 = vpop.f32.mrf.mxu1  ;;  %v828_v21 = vadd.f32 %v759_v6, %v502_v38  ;;  %v830_v22 = vadd.f32 %v812_v53, %v555_v39 }
 0x10d   :  { %v896_v15 = vadd.f32 %v878_v5, %v874_v48  ;;  %v910_v16 = vadd.f32 %v880_v2, %v876_v54  ;;  %v831_v30 = vadd.f32 %v761_v11, %v504_v47  ;;  %v833_v31 = vadd.f32 %v814_v12, %v557_v50 }
 0x10e   :  { %v890_v17 = vrot.slane %v889_v7, 4  ;;  %v904_v19 = vrot.slane %v903_v8, 4  ;;  %v763_v32 = vpop.f32.mrf.mxu0  ;;  %v816_v33 = vpop.f32.mrf.mxu1  ;;  %v881_v36 = vmax.f32 %v865_v9, 0.0  ;;  %v883_v37 = vmax.f32 %v867_v10, 0.0 }
 0x10f   :  { %v897_v26 = vrot.slane %v896_v15, 4  ;;  %v911_v28 = vrot.slane %v910_v16, 4  ;;  %v869_v56 = vadd.f32 %v2065_v18, %v831_v30  ;;  %v871_v49 = vadd.f32 %v2067_v20, %v833_v31 }
 0x110   :  { %v891_v34 = vadd.f32 %v890_v17, %v889_v7  ;;  %v905_v35 = vadd.f32 %v904_v19, %v903_v8  ;;  %v866_v40 = vadd.f32 %v2069_v27, %v828_v21  ;;  %v868_v38 = vadd.f32 %v2071_v29, %v830_v22 }
 0x111   :  { %v898_v55 = vadd.f32 %v897_v26, %v896_v15  ;;  %v912_v43 = vadd.f32 %v911_v28, %v910_v16  ;;  %v832_v39 = vadd.f32 %v763_v32, %v506_v13  ;;  %v834_v41 = vadd.f32 %v816_v33, %v559_v14 }
 0x112   :  { %v892_v42 = vrot.slane %v891_v34, 2  ;;  %v906_v57 = vrot.slane %v905_v35, 2  ;;  %v885_v25 = vmax.f32 %v869_v56, 0.0  ;;  %v887_v58 = vmax.f32 %v871_v49, 0.0 }
 0x113   :  { %v899_v59 = vrot.slane %v898_v55, 2  ;;  %v913_v44 = vrot.slane %v912_v43, 2  ;;  %v870_v45 = vadd.f32 %v2069_v27, %v832_v39  ;;  %v872_v46 = vadd.f32 %v2071_v29, %v834_v41 }
 0x114   :  { %v917_v47 = vadd.f32 %v885_v25, %v881_v36  ;;  %v931_v18 = vadd.f32 %v887_v58, %v883_v37  ;;  %v882_v50 = vmax.f32 %v866_v40, 0.0  ;;  %v884_v20 = vmax.f32 %v868_v38, 0.0 }
 0x115   :  { %v886_v51 = vmax.f32 %v870_v45, 0.0  ;;  %v888_v52 = vmax.f32 %v872_v46, 0.0  ;;  %v893_v24 = vadd.f32 %v892_v42, %v891_v34  ;;  %v907_v23 = vadd.f32 %v906_v57, %v905_v35 }
 0x116   :  { %v918_v60 = vrot.slane %v917_v47, 4  ;;  %v932_v61 = vrot.slane %v931_v18, 4  ;;  %v900_v62 = vadd.f32 %v899_v59, %v898_v55  ;;  %v914_v63 = vadd.f32 %v913_v44, %v912_v43 }
 0x117   :  { %v924_v0 = vadd.f32 %v886_v51, %v882_v50  ;;  %v938_v1 = vadd.f32 %v888_v52, %v884_v20  ;;  %v894_v53 = vrot.slane %v893_v24, 1  ;;  %v908_v29 = vrot.slane %v907_v23, 1 }
 0x118   :  { %v919_v3 = vadd.f32 %v918_v60, %v917_v47  ;;  %v933_v4 = vadd.f32 %v932_v61, %v931_v18  ;;  %v901_v5 = vrot.slane %v900_v62, 1  ;;  %v915_v2 = vrot.slane %v914_v63, 1 }
 0x119   :  { %v925_v6 = vrot.slane %v924_v0, 4  ;;  %v939_v27 = vrot.slane %v938_v1, 4  ;;  %v895_v13 = vadd.f32 %v894_v53, %v893_v24  ;;  %v909_v14 = vadd.f32 %v908_v29, %v907_v23  ;;  %v1452_v24 = vld [vmem:[%s2105_s4] ss:$0 sm:$0xff] }
 0x11a   :  { %v920_v48 = vrot.slane %v919_v3, 2  ;;  %v934_v54 = vrot.slane %v933_v4, 2  ;;  %v902_v21 = vadd.f32 %v901_v5, %v900_v62  ;;  %v916_v22 = vadd.f32 %v915_v2, %v914_v63 }
 0x11b   :  { %v926_v7 = vadd.f32 %v925_v6, %v924_v0  ;;  %v940_v8 = vadd.f32 %v939_v27, %v938_v1  ;;  %v945_v32 = vpack.c.bf16 %v895_v13, %v895_v13  ;;  %v947_v33 = vpack.c.bf16 %v909_v14, %v909_v14 }
 0x11c   :  { %v921_v9 = vadd.f32 %v920_v48, %v919_v3  ;;  %v935_v10 = vadd.f32 %v934_v54, %v933_v4  ;;  %v946_v37 = vpack.c.bf16 %v902_v21, %v902_v21  ;;  %v948_v43 = vpack.c.bf16 %v916_v22, %v916_v22 }
 0x11d   :  { %v927_v11 = vrot.slane %v926_v7, 2  ;;  %v941_v12 = vrot.slane %v940_v8, 2  ;;  %v1032_v39 = vunpack.c.l.b16 %v945_v32  ;;  %v1034_v41 = vunpack.c.l.b16 %v947_v33 }
 0x11e   :  { %v922_v15 = vrot.slane %v921_v9, 1  ;;  %v936_v16 = vrot.slane %v935_v10, 1  ;;  %v1033_v42 = vunpack.c.l.b16 %v946_v37  ;;  %v1035_v25 = vunpack.c.l.b16 %v948_v43 }
 0x11f   :  { %v928_v17 = vadd.f32 %v927_v11, %v926_v7  ;;  %v942_v19 = vadd.f32 %v941_v12, %v940_v8 }
 0x120   :  { %v923_v26 = vadd.f32 %v922_v15, %v921_v9  ;;  %v937_v28 = vadd.f32 %v936_v16, %v935_v10 }
 0x121   :  { %v929_v30 = vrot.slane %v928_v17, 1  ;;  %v943_v31 = vrot.slane %v942_v19, 1 }
 0x122   :  { %v949_v34 = vpack.c.bf16 %v923_v26, %v923_v26  ;;  %v951_v35 = vpack.c.bf16 %v937_v28, %v937_v28 }
 0x123   :  { %v930_v36 = vadd.f32 %v929_v30, %v928_v17  ;;  %v944_v55 = vadd.f32 %v943_v31, %v942_v19 }
 0x124   :  { %v1036_v56 = vunpack.c.l.b16 %v949_v34  ;;  %v1038_v49 = vunpack.c.l.b16 %v951_v35 }
 0x125   :  { %v950_v40 = vpack.c.bf16 %v930_v36, %v930_v36  ;;  %v952_v38 = vpack.c.bf16 %v944_v55, %v944_v55 }
 0x126   :  { %v1041_v59 = vsel %vm1040_vm8, %v1036_v56, %v1032_v39  ;;  %v1043_v44 = vsel %vm1040_vm8, %v1038_v49, %v1034_v41 }
 0x127   :  { %v1037_v57 = vunpack.c.l.b16 %v950_v40  ;;  %v1039_v58 = vunpack.c.l.b16 %v952_v38  ;;  %v1045_v50 = vpack.c.b16 %v1041_v59, %v1041_v59  ;;  %v1047_v20 = vpack.c.b16 %v1043_v44, %v1043_v44 }
 0x129   :  { %v1042_v45 = vsel %vm1040_vm8, %v1037_v57, %v1033_v42  ;;  %v1044_v46 = vsel %vm1040_vm8, %v1039_v58, %v1035_v25 }
 0x12a   :  { %v1046_v47 = vpack.c.b16 %v1042_v45, %v1042_v45  ;;  %v1048_v18 = vpack.c.b16 %v1044_v46, %v1044_v46 }
 0x12c   :  { %1277 = vmatprep.mubr.bf16.mxu0 %v1046_v47  ;;  %1317 = vmatprep.mubr.bf16.mxu1 %v1048_v18 }
 0x12d   :  { %1278 = vmatmul.mubr.bf16.vlgmr.msra.gmra.mxu0 %v1045_v50  ;;  %1318 = vmatmul.mubr.bf16.vlgmr.msra.gmra.mxu1 %v1047_v20 }
 0x1ed   :  { %v1501_v51 = vpop.f32.mrf.mxu0  ;;  %v1523_v52 = vpop.f32.mrf.mxu1 }
 0x1ef   :  { %v1502_v23 = vpop.f32.mrf.mxu0  ;;  %v1524_v60 = vpop.f32.mrf.mxu1 }
 0x1f0   :  { %v1503_v61 = vadd.f32 %v1502_v23, %v1501_v51  ;;  %v1525_v1 = vadd.f32 %v1524_v60, %v1523_v52 }
 0x1f1   :  { %v1504_v62 = vpop.f32.mrf.mxu0  ;;  %v1526_v63 = vpop.f32.mrf.mxu1 }
 0x1f2   :  { %v1280_v0 = vadd.f32 %v1503_v61, %v1452_v24 }
 0x1f3   :  { %v1505_v3 = vpop.f32.mrf.mxu0  ;;  %v1527_v4 = vpop.f32.mrf.mxu1 }
 0x1f4   :  { %v1320_v6 = vadd.f32 %v1525_v1, %v1280_v0 }
 0x1f6   :  { %1325 = vst [vmem:[%s2106_s5] sm:$0x3] %v1320_v6 }

</bundles_post_ra>
